<compile_context>
chip_gen: v7x
topology: tpu7x:2x2x1
jax: 0.10.0
libtpu: 0.0.40
codegen_flags: <defaults>
</compile_context>

<pallas_src>
import jax
import jax.numpy as jnp
from jax.experimental import pallas as pl
from jax.experimental.pallas import tpu as pltpu

LANES = 128      # vreg lane width
SUBLANES = 8     # vreg sublane count
MAX_TB = 2048    # max batch-tile (lanes) per grid step


def _round_up(x, m):
    return (x + m - 1) // m * m


def _choose_tb(b128):
    """Batch tile size: 128-aligned, <= MAX_TB, and >= 2 blocks when possible."""
    if b128 <= LANES:
        return LANES
    for tb in (2048, 1024, 512, 256, 128):
        if b128 >= 2 * tb:
            return tb
    return LANES


def pack_params(w1, b1, w2, b2, wo, bo, mat_dtype=jnp.float32):
    """Pack ODEFunc params for the transposed (hidden-on-sublanes) kernel layout.

    Weights are given as (in_features, out_features); biases as (1, out_features).
    Returns (vec_params f32 (128,8), w2_T mat_dtype (128,128), wo_T mat_dtype (O_pad,128)).
    Hidden/output dims are zero-padded; SiLU(0)=0 keeps padded units exactly inert.
    """
    H = w2.shape[0]
    O = wo.shape[1]
    assert H <= LANES, "this packing assumes hidden_dim <= 128"
    o_rows = _round_up(max(O, 1), SUBLANES)
    assert o_rows <= LANES, "this packing assumes output_dim <= 128"

    vec = jnp.zeros((LANES, SUBLANES), jnp.float32)
    vec = vec.at[:H, 0].set(w1.reshape(-1).astype(jnp.float32))   # w1  (lin1 weight)
    vec = vec.at[:H, 1].set(b1.reshape(-1).astype(jnp.float32))   # b1
    vec = vec.at[:H, 2].set(b2.reshape(-1).astype(jnp.float32))   # b2
    vec = vec.at[:O, 3].set(bo.reshape(-1).astype(jnp.float32))   # bo

    w2t = jnp.zeros((LANES, LANES), jnp.float32)
    w2t = w2t.at[:H, :H].set(w2.T.astype(jnp.float32)).astype(mat_dtype)

    wot = jnp.zeros((o_rows, LANES), jnp.float32)
    wot = wot.at[:O, :H].set(wo.T.astype(jnp.float32)).astype(mat_dtype)
    return vec, w2t, wot


def _silu(x):
    # x * sigmoid(x); exp + reciprocal both live on the EUP slot.
    # approx=False keeps f32-exact numerics; approx=True is a further (lossy) option.
    return x * pl.reciprocal(1.0 + jnp.exp(-x), approx=False)


def odefunc_kernel(t_ref, vec_ref, w2t_ref, wot_ref, out_ref):
    t = t_ref[...]                                   # (1, TB)   batch on lanes
    o_rows = out_ref.shape[0]

    w1c = vec_ref[:, 0:1]                            # (128, 1)  hidden on sublanes
    b1c = vec_ref[:, 1:2]
    b2c = vec_ref[:, 2:3]
    boc = vec_ref[0:o_rows, 3:4]                     # (O_pad, 1)

    mdt = w2t_ref.dtype                              # matmul-operand dtype (f32 or bf16)

    # lin1: rank-1 outer product -> VPU broadcast multiply + bias add, SiLU in f32.
    x = _silu(w1c * t + b1c)                         # (128, TB) f32

    # lin2: 128-wide contraction on the MXU, f32 accumulation, SiLU in f32.
    x = _silu(jnp.dot(w2t_ref[...], x.astype(mdt),
                      preferred_element_type=jnp.float32) + b2c)   # (128, TB)

    # lout: small (O_pad x 128) contraction; output stays lane-dense on TB lanes.
    y = jnp.dot(wot_ref[...], x.astype(mdt),
                preferred_element_type=jnp.float32) + boc          # (O_pad, TB)
    out_ref[...] = y.astype(out_ref.dtype)


def odefunc_forward(t, packed_params, output_dim):
    """t: (B,) or (B, 1) scalar times.  Returns (B, output_dim) float32."""
    vec_par, w2t, wot = packed_params
    o_rows = wot.shape[0]

    t = jnp.asarray(t, jnp.float32).reshape(1, -1)   # (1, B): batch on lanes
    B = t.shape[1]

    b128 = _round_up(max(B, 1), LANES)
    TB = _choose_tb(b128)
    B_pad = _round_up(b128, TB)
    if B_pad != B:
        t = jnp.pad(t, ((0, 0), (0, B_pad - B)))
    grid = (B_pad // TB,)

    param_bytes = (vec_par.size * vec_par.dtype.itemsize
                   + w2t.size * w2t.dtype.itemsize
                   + wot.size * wot.dtype.itemsize)
    cost = pl.CostEstimate(
        flops=int(2 * B_pad * LANES * (LANES + o_rows) + 6 * B_pad * LANES),
        transcendentals=int(2 * B_pad * LANES),
        bytes_accessed=int(B_pad * 4 + B_pad * o_rows * 4 + param_bytes),
    )

    out = pl.pallas_call(
        odefunc_kernel,
        out_shape=jax.ShapeDtypeStruct((o_rows, B_pad), jnp.float32),
        grid=grid,
        in_specs=[
            pl.BlockSpec((1, TB), lambda i: (0, i)),            # lane-dense t tile
            pl.BlockSpec(vec_par.shape, lambda i: (0, 0)),      # resident f32 vectors
            pl.BlockSpec(w2t.shape, lambda i: (0, 0)),          # resident w2^T
            pl.BlockSpec(wot.shape, lambda i: (0, 0)),          # resident wo^T
        ],
        out_specs=pl.BlockSpec((o_rows, TB), lambda i: (0, i)),  # lane-dense output tile
        compiler_params=pltpu.CompilerParams(
            dimension_semantics=("parallel",),                   # megacore-split batch
        ),
        cost_estimate=cost,
    )(t, vec_par, w2t, wot)

    return out[:output_dim, :B].T                                # (B, output_dim)


def init_params(key, hidden_dim, output_dim):
    """Deterministic init mimicking nn.Linear's U(-1/sqrt(fan_in), 1/sqrt(fan_in)).

    Weights stored pre-transposed as (in_features, out_features); biases (1, out).
    """
    ks = jax.random.split(key, 6)

    def uniform(k, shape, fan_in):
        bound = 1.0 / jnp.sqrt(jnp.float32(fan_in))
        return jax.random.uniform(k, shape, jnp.float32, -bound, bound)

    w1 = uniform(ks[0], (1, hidden_dim), 1)
    b1 = uniform(ks[1], (1, hidden_dim), 1)
    w2 = uniform(ks[2], (hidden_dim, hidden_dim), hidden_dim)
    b2 = uniform(ks[3], (1, hidden_dim), hidden_dim)
    wo = uniform(ks[4], (hidden_dim, output_dim), hidden_dim)
    bo = uniform(ks[5], (1, output_dim), hidden_dim)
    return w1, b1, w2, b2, wo, bo


def reference_forward(t, w1, b1, w2, b2, wo, bo):
    silu = lambda x: x * jax.nn.sigmoid(x)
    x = silu(t @ w1 + b1)
    x = silu(x @ w2 + b2)
    return x @ wo + bo


if __name__ == "__main__":
    hidden_dim = 32
    output_dim = 4

    key = jax.random.PRNGKey(0)
    k_params, k_t = jax.random.split(key)
    params = init_params(k_params, hidden_dim, output_dim)

    # Batch several t evaluations per call (amortizes launch/DMA overhead).
    # 256 -> 2x128-row tiles (exercises the tiled grid); 200 -> ragged batch
    # (exercises always-pad-and-tile instead of the old single-block fallback).
    for batch in (256, 200):
        t = jax.random.uniform(jax.random.fold_in(k_t, batch), (batch, 1), jnp.float32)
        ref = reference_forward(t, *params)

        # f32 matmul operands: exact semantics of the original module.
        packed_f32 = pack_params(*params, mat_dtype=jnp.float32)
        out = jax.block_until_ready(odefunc_forward(t, packed_f32, output_dim))
        assert out.shape == (batch, output_dim)
        assert jnp.allclose(out, ref, atol=5e-5, rtol=1e-5), "f32 mismatch vs reference"

        # bf16 MXU operands (v6e/v7x fast path), f32 accumulation/activations.
        packed_bf16 = pack_params(*params, mat_dtype=jnp.bfloat16)
        out_bf = jax.block_until_ready(odefunc_forward(t, packed_bf16, output_dim))
        assert out_bf.shape == (batch, output_dim)
        assert jnp.allclose(out_bf, ref, atol=3e-2, rtol=3e-2), "bf16 mismatch vs reference"

    print("KERNEL_OK")
</pallas_src>

<mosaic_0001>
module attributes {stable_mosaic.version = 11 : i64} {
  func.func @odefunc_kernel(%arg0: i32, %arg1: memref<1x128xf32, #tpu.memory_space<vmem>>, %arg2: memref<128x8xf32, #tpu.memory_space<vmem>>, %arg3: memref<128x128xf32, #tpu.memory_space<vmem>>, %arg4: memref<8x128xf32, #tpu.memory_space<vmem>>, %arg5: memref<8x128xf32, #tpu.memory_space<vmem>>) attributes {dimension_semantics = [#tpu.dimension_semantics<parallel>], iteration_bounds = array<i64: 2>, scalar_prefetch = 0 : i64, scratch_operands = 0 : i64, tpu.core_type = #tpu.core_type<tc>, window_params = [{transform_indices = @transform_0, window_bounds = array<i64: 1, 128>}, {pipeline_mode = #tpu.pipeline_mode<synchronous>, transform_indices = @transform_1, window_bounds = array<i64: 128, 8>}, {pipeline_mode = #tpu.pipeline_mode<synchronous>, transform_indices = @transform_2, window_bounds = array<i64: 128, 128>}, {pipeline_mode = #tpu.pipeline_mode<synchronous>, transform_indices = @transform_3, window_bounds = array<i64: 8, 128>}, {transform_indices = @transform_4, window_bounds = array<i64: 8, 128>}]} {
    %c0 = arith.constant 0 : index
    %c0_0 = arith.constant 0 : index
    %0 = vector.load %arg1[%c0, %c0_0] : memref<1x128xf32, #tpu.memory_space<vmem>>, vector<1x128xf32>
    %c0_1 = arith.constant 0 : index
    %c0_2 = arith.constant 0 : index
    %1 = vector.load %arg2[%c0_1, %c0_2] : memref<128x8xf32, #tpu.memory_space<vmem>>, vector<128x1xf32>
    %c0_3 = arith.constant 0 : index
    %c1 = arith.constant 1 : index
    %2 = vector.load %arg2[%c0_3, %c1] : memref<128x8xf32, #tpu.memory_space<vmem>>, vector<128x1xf32>
    %c0_4 = arith.constant 0 : index
    %c2 = arith.constant 2 : index
    %3 = vector.load %arg2[%c0_4, %c2] : memref<128x8xf32, #tpu.memory_space<vmem>>, vector<128x1xf32>
    %c0_5 = arith.constant 0 : index
    %c3 = arith.constant 3 : index
    %4 = vector.load %arg2[%c0_5, %c3] : memref<128x8xf32, #tpu.memory_space<vmem>>, vector<8x1xf32>
    %5 = vector.broadcast %1 : vector<128x1xf32> to vector<128x128xf32>
    %6 = vector.broadcast %0 : vector<1x128xf32> to vector<128x128xf32>
    %7 = arith.mulf %5, %6 : vector<128x128xf32>
    %8 = vector.broadcast %2 : vector<128x1xf32> to vector<128x128xf32>
    %9 = arith.addf %7, %8 : vector<128x128xf32>
    %cst = arith.constant 0.000000e+00 : f32
    %10 = vector.broadcast %cst : f32 to vector<128x128xf32>
    %11 = arith.subf %10, %9 : vector<128x128xf32>
    %12 = math.exp %11 : vector<128x128xf32>
    %cst_6 = arith.constant 1.000000e+00 : f32
    %13 = vector.broadcast %cst_6 : f32 to vector<128x128xf32>
    %14 = arith.addf %13, %12 : vector<128x128xf32>
    %15 = tpu.reciprocal %14 : vector<128x128xf32> -> vector<128x128xf32>
    %16 = arith.mulf %9, %15 : vector<128x128xf32>
    %c0_7 = arith.constant 0 : index
    %c0_8 = arith.constant 0 : index
    %17 = vector.load %arg3[%c0_7, %c0_8] : memref<128x128xf32, #tpu.memory_space<vmem>>, vector<128x128xf32>
    %cst_9 = arith.constant dense<0.000000e+00> : vector<128x128xf32>
    %18 = tpu.matmul %17, %16, %cst_9 {dimension_numbers = #tpu.dot_dimension_numbers<[1], [0], [0], [1], [0, 0, 1, 1], [], []>} : vector<128x128xf32>, vector<128x128xf32>, vector<128x128xf32> -> vector<128x128xf32>
    %19 = vector.broadcast %3 : vector<128x1xf32> to vector<128x128xf32>
    %20 = arith.addf %18, %19 : vector<128x128xf32>
    %cst_10 = arith.constant 0.000000e+00 : f32
    %21 = vector.broadcast %cst_10 : f32 to vector<128x128xf32>
    %22 = arith.subf %21, %20 : vector<128x128xf32>
    %23 = math.exp %22 : vector<128x128xf32>
    %cst_11 = arith.constant 1.000000e+00 : f32
    %24 = vector.broadcast %cst_11 : f32 to vector<128x128xf32>
    %25 = arith.addf %24, %23 : vector<128x128xf32>
    %26 = tpu.reciprocal %25 : vector<128x128xf32> -> vector<128x128xf32>
    %27 = arith.mulf %20, %26 : vector<128x128xf32>
    %c0_12 = arith.constant 0 : index
    %c0_13 = arith.constant 0 : index
    %28 = vector.load %arg4[%c0_12, %c0_13] : memref<8x128xf32, #tpu.memory_space<vmem>>, vector<8x128xf32>
    %cst_14 = arith.constant dense<0.000000e+00> : vector<8x128xf32>
    %29 = tpu.matmul %28, %27, %cst_14 {dimension_numbers = #tpu.dot_dimension_numbers<[1], [0], [0], [1], [0, 0, 1, 1], [], []>} : vector<8x128xf32>, vector<128x128xf32>, vector<8x128xf32> -> vector<8x128xf32>
    %30 = vector.broadcast %4 : vector<8x1xf32> to vector<8x128xf32>
    %31 = arith.addf %29, %30 : vector<8x128xf32>
    %c0_15 = arith.constant 0 : index
    %c0_16 = arith.constant 0 : index
    %32 = vector.load %arg5[%c0_15, %c0_16] : memref<8x128xf32, #tpu.memory_space<vmem>>, vector<8x128xf32>
    tpu.vector_store %arg5[%c0_15, %c0_16], %31 {strides = array<i32>} : memref<8x128xf32, #tpu.memory_space<vmem>>, vector<8x128xf32>,
    return
  }
  func.func @transform_0(%arg0: i32) -> (i32, i32) {
    %c0_i32 = arith.constant 0 : i32
    %c0_i32_0 = arith.constant 0 : i32
    return %c0_i32, %arg0 : i32, i32
  }
  func.func @transform_1(%arg0: i32) -> (i32, i32) {
    %c0_i32 = arith.constant 0 : i32
    %c0_i32_0 = arith.constant 0 : i32
    %c0_i32_1 = arith.constant 0 : i32
    return %c0_i32, %c0_i32_0 : i32, i32
  }
  func.func @transform_2(%arg0: i32) -> (i32, i32) {
    %c0_i32 = arith.constant 0 : i32
    %c0_i32_0 = arith.constant 0 : i32
    %c0_i32_1 = arith.constant 0 : i32
    return %c0_i32, %c0_i32_0 : i32, i32
  }
  func.func @transform_3(%arg0: i32) -> (i32, i32) {
    %c0_i32 = arith.constant 0 : i32
    %c0_i32_0 = arith.constant 0 : i32
    %c0_i32_1 = arith.constant 0 : i32
    return %c0_i32, %c0_i32_0 : i32, i32
  }
  func.func @transform_4(%arg0: i32) -> (i32, i32) {
    %c0_i32 = arith.constant 0 : i32
    %c0_i32_0 = arith.constant 0 : i32
    return %c0_i32, %arg0 : i32, i32
  }
}

</mosaic_0001>

<bundles_post_ra>
// kernel: tpu_custom_call.1
= control target key start
LH: loop header
LB: loop body
LE: loop exit
PB: predicated region body
PF: predicated region fallthrough
CT: control target
= control target key end

     0   :  { %9 = vsyncpa [#allocation3], 0  ;;  %s1881_s0 = inlined_call_operand.vmem [shape: f32[1,256], index: 0, kind: input, shape index: {}]   ;;  %s1882_s1 = inlined_call_operand.vmem [shape: f32[128,8], index: 1, kind: input, shape index: {}]   ;;  %s1883_s2 = inlined_call_operand.vmem [shape: f32[128,128], index: 2, kind: input, shape index: {}]   ;;  %s1884_s3 = inlined_call_operand.vmem [shape: f32[8,128], index: 3, kind: input, shape index: {}]   ;;  %s1885_s4 = inlined_call_operand.hbm [shape: f32[8,256], index: 4, kind: output, shape index: {}]  }
   0x1   :  { %11 = vsyncpa [#allocation3 + $0x1], 0  ;;  %s1450_s15 = smov 0   ;;  %s1452_s16 = smov 0  }
   0x2   :  { %s1454_s17 = smov 0   ;;  %s1456_s18 = smov 0  }
   0x3 LB: > { %s1471_s19 = sadd.s32 4294967295, %s1415_s18   ;;  %s952_s20 = sadd.s32 4294967294, %s1415_s18   ;;  %s1415_s18 = sphi %s1456_s18, %s1891_s18   ;;  %s1411_s17 = sphi %s1454_s17, %s1890_s17   ;;  %s1407_s16 = sphi %s1452_s16, %s1889_s16   ;;  %s1403_s15 = sphi %s1450_s15, %s1888_s15  }
   0x4   : > { %s1475_s21 = sadd.s32 1, %s1415_s18   ;;  %s113_s22 = sadd.s32 1, %s1411_s17 }
   0x5   : > { %s110_s23 = ssub.s32 %s1415_s18, %s1475_s21  ;;  %p123_p0 = scmp.ne.s32.totalorder %s1411_s17, %s1407_s16 }
   0x6   : > { %p111_p1 = scmp.eq.s32.totalorder %s110_s23, 0  ;;  %p124_p2 = scmp.eq.s32.totalorder %s1471_s19, 1 }
   0x7   : > { %p129_p3 = scmp.ne.s32.totalorder %s1407_s16, %s1403_s15  ;;  %p130_p4 = scmp.eq.s32.totalorder %s952_s20, 1 }
   0x8   : > { %s1486_s24 = scalar_select %p111_p1, %s1411_s17, %s113_s22  }
   0x9   : > { %p1488_p5 = por %p124_p2, %p123_p0  ;;  %p1492_p6 = por %p130_p4, %p129_p3 }
   0xa   : > { %p955_p7 = scmp.ge.s32.totalorder %s1415_s18, 1  ;;  %p163_p8 = scmp.lt.s32.totalorder %s1415_s18, 3 }
   0xc   : > { %p164_p9 = pnand %p955_p7, %p163_p8 }
   0xd   : > { %v1501_v0 = vld [vmem:[%s1882_s1 + $0x10] sm:$0xff] (!%p164_p9)  ;;  %v1506_v1 = vld [vmem:[%s1882_s1] sm:$0xff] (!%p164_p9)  ;;  %v1417_v2 = vmov (!%p164_p9), 1   ;;  %v1520_v4 = vld [vmem:[%s1882_s1 + $0x8] sm:$0xff] (!%p164_p9)  ;;  %v1418_v7 = vmov (!%p164_p9), 0   ;;  %p187_p10 = scmp.lt.s32.totalorder (!%p164_p9), %s1471_s19, 1 }
   0xe   : > { %167 = sbr.rel (%p164_p9) target bundleno = 775 (0x307), region = 36  ;;  %1206 = vset.pattern.permute.xlu0 (!%p164_p9), %v1417_v2  ;;  %1204 = vset.pattern.permute.xlu1 (!%p164_p9), %v1417_v2  ;;  %v1515_v3 = vld [vmem:[%s1882_s1 + $0x30] sm:$0xff] (!%p164_p9)  ;;  %v1532_v6 = vld [vmem:[%s1882_s1 + $0x18] sm:$0xff] (!%p164_p9)  ;;  %v1542_v8 = vld [vmem:[%s1882_s1 + $0x20] sm:$0xff] (!%p164_p9)  ;;  %v1419_v51 = vmov (!%p164_p9), 2   ;;  %vm1421_vm0 = vmmov (!%p164_p9), 0  }
   0xf   : > { %318 = vperm.xlu0 (!%p164_p9), %1206, %v1501_v0   ;;  %310 = vperm.xlu1 (!%p164_p9), %1204, %v1506_v1   ;;  %v1527_v5 = vld [vmem:[%s1882_s1 + $0x50] sm:$0xff] (!%p164_p9)  ;;  %v1550_v9 = vld [vmem:[%s1882_s1 + $0x28] sm:$0xff] (!%p164_p9)  ;;  %v1565_v11 = vld [vmem:[%s1882_s1 + $0x38] sm:$0xff] (!%p164_p9)  ;;  %s184_s29 = sand.u32 (!%p164_p9), 1, %s1407_s16   ;;  %s959_s5 = sshll.u32 (!%p164_p9), %s1471_s19, 7 }
  0x10   : > { %v1560_v10 = vld [vmem:[%s1882_s1 + $0x48] sm:$0xff] (!%p164_p9)  ;;  %v1580_v13 = vld [vmem:[%s1882_s1 + $0x40] sm:$0xff] (!%p164_p9)  ;;  %v1586_v14 = vld [vmem:[%s1882_s1 + $0x70] sm:$0xff] (!%p164_p9)  ;;  %s1839_s10 = scalar_lea.hbm (!%p164_p9), %s1885_s4, %s959_s5  ;;  %s883_s11 = scalar_lea.sflag (!%p164_p9), [#allocation3], %s184_s29 }
  0x11   : > { %v1575_v12 = vld [vmem:[%s1882_s1 + $0x68] sm:$0xff] (!%p164_p9)  ;;  %v1598_v15 = vld [vmem:[%s1882_s1 + $0x58] sm:$0xff] (!%p164_p9)  ;;  %v1606_v16 = vld [vmem:[%s1882_s1 + $0x60] sm:$0xff] (!%p164_p9) }
  0x12   : > { %v1615_v17 = vld [vmem:[%s1882_s1 + $0x78] sm:$0xff] (!%p164_p9)  ;;  %v485_v18 = vld [vmem:[%s1883_s2] sm:$0xff] (!%p164_p9) }
  0x13   : > { %334 = vperm.xlu0 (!%p164_p9), %1206, %v1515_v3   ;;  %314 = vperm.xlu1 (!%p164_p9), %1204, %v1520_v4  }
  0x14   : > { %1043 = vmatprep.mubr.f32.mxu0 (!%p164_p9), %v485_v18 }
  0x15   : > { %s188_s27 = scalar_select %p187_p10, %s1471_s19, 1 }
  0x16   : > { %s1424_s19 = smov [#allocation2]  }
  0x17   : > { %350 = vperm.xlu0 %1206, %v1527_v5   ;;  %1205 = vset.pattern.permute.xlu1 %v1418_v7  ;;  %s189_s30 = scalar_lea.vmem %s1881_s0, %s188_s27  ;;  %s1357_s13 = sshll.u32 %s1424_s19, 4  ;;  %s1358_s13 = int_to_ptr.vmem [resolvable:$false] %s1357_s13 }
  0x18   : > { %224 = vperm.xlu1 %1205, %v1532_v6   ;;  %v1630_v25 = vld [vmem:[%s189_s30] ss:$0 sm:$0xff]  ;;  %s956_s30 = sshll.u32 %s184_s29, 3  ;;  %s1359_s14 = scalar_lea.vmem %s1358_s13, 256 }
  0x19   : > { %s186_s6 = scalar_lea.vmem [#allocation2], %s956_s30 }
  0x1a   : > { %s896_s7 = sshll.u32 %s186_s6, 4  ;;  %s1841_s7 = int_to_ptr.vmem [resolvable:$true] %s896_s7 }
  0x1b   : > { %1215 = vset.pattern.permute.xlu0 %v1418_v7  ;;  %s1353_s12 = scalar_lea.vmem %s1841_s7, 128  ;;  %p1360_p0 = scmp.lt.s32.totalorder %s1841_s7, %s1358_s13 }
  0x1c   : > { %209 = vperm.xlu0 %1215, %v1506_v1   ;;  %1207 = vset.pattern.permute.xlu1 %v1417_v2  ;;  %p1354_p11 = scmp.ne.s32.totalorder %s1841_s7, %s1353_s12  ;;  %p1361_p1 = scmp.lt.s32.totalorder %s1359_s14, %s1353_s12 }
  0x1d   : > { %322 = vperm.xlu1 %1207, %v1532_v6  }
  0x1e   : > { %p1355_p12 = pnand %p1354_p11, %p1488_p5  ;;  %p1362_p2 = por %p1361_p1, %p1360_p0 }
  0x20   : > { %214 = vperm.xlu0 %1215, %v1520_v4   ;;  %p1356_p13 = pneg %p1355_p12 }
  0x21   : > { %1208 = vset.pattern.permute.xlu1 %v1418_v7 }
  0x22   : > { %229 = vperm.xlu1 %1208, %v1542_v8   ;;  %p1363_p3 = pnand %p1362_p2, %p1356_p13 }
  0x24   : > { %219 = vperm.xlu0 %1215, %v1501_v0  }
  0x26   : > { %1209 = vset.pattern.permute.xlu1 %v1417_v2 }
  0x27   : > { %326 = vperm.xlu1 %1209, %v1542_v8  }
  0x28   : > { %234 = vperm.xlu0 %1215, %v1550_v9  }
  0x2b   : > { %330 = vperm.xlu1 %1209, %v1550_v9  }
  0x2c   : > { %239 = vperm.xlu0 %1215, %v1515_v3  }
  0x2f   : > { %1210 = vset.pattern.permute.xlu1 %v1418_v7 }
  0x30   : > { %254 = vperm.xlu0 %1215, %v1560_v10   ;;  %244 = vperm.xlu1 %1210, %v1565_v11  }
  0x34   : > { %259 = vperm.xlu0 %1215, %v1527_v5   ;;  %1211 = vset.pattern.permute.xlu1 %v1417_v2 }
  0x35   : > { %338 = vperm.xlu1 %1211, %v1565_v11  }
  0x38   : > { %274 = vperm.xlu0 %1215, %v1575_v12  }
  0x39   : > { %1212 = vset.pattern.permute.xlu1 %v1418_v7 }
  0x3a   : > { %249 = vperm.xlu1 %1212, %v1580_v13  }
  0x3c   : > { %279 = vperm.xlu0 %1215, %v1586_v14  }
  0x3e   : > { %1213 = vset.pattern.permute.xlu1 %v1417_v2 }
  0x3f   : > { %342 = vperm.xlu1 %1213, %v1580_v13  }
  0x40   : > { %1220 = vset.pattern.permute.xlu0 %v1417_v2 }
  0x41   : > { %366 = vperm.xlu0 %1220, %v1586_v14  }
  0x43   : > { %346 = vperm.xlu1 %1213, %v1560_v10  }
  0x45   : > { %1223 = vset.pattern.permute.xlu0 %v1419_v51 }
  0x46   : > { %506 = vperm.xlu0 %1223, %v1520_v4  }
  0x47   : > { %1214 = vset.pattern.permute.xlu1 %v1418_v7 }
  0x48   : > { %264 = vperm.xlu1 %1214, %v1598_v15  }
  0x4a   : > { %518 = vperm.xlu0 %1223, %v1542_v8  }
  0x4c   : > { %1216 = vset.pattern.permute.xlu1 %v1417_v2 }
  0x4d   : > { %354 = vperm.xlu1 %1216, %v1598_v15  }
  0x4e   : > { %526 = vperm.xlu0 %1223, %v1515_v3  }
  0x51   : > { %1217 = vset.pattern.permute.xlu1 %v1418_v7 }
  0x52   : > { %269 = vperm.xlu1 %1217, %v1606_v16   ;;  %534 = vperm.xlu0 %1223, %v1580_v13  }
  0x56   : > { %1218 = vset.pattern.permute.xlu1 %v1417_v2  ;;  %542 = vperm.xlu0 %1223, %v1527_v5  }
  0x57   : > { %358 = vperm.xlu1 %1218, %v1606_v16  }
  0x5a   : > { %550 = vperm.xlu0 %1223, %v1606_v16  }
  0x5b   : > { %362 = vperm.xlu1 %1218, %v1575_v12  }
  0x5e   : > { %558 = vperm.xlu0 %1223, %v1586_v14  }
  0x5f   : > { %1219 = vset.pattern.permute.xlu1 %v1418_v7 }
  0x60   : > { %284 = vperm.xlu1 %1219, %v1615_v17  }
  0x64   : > { %1221 = vset.pattern.permute.xlu1 %v1417_v2 }
  0x65   : > { %370 = vperm.xlu1 %1221, %v1615_v17  }
  0x69   : > { %1222 = vset.pattern.permute.xlu1 %v1419_v51 }
  0x6a   : > { %502 = vperm.xlu1 %1222, %v1506_v1  }
  0x6e   : > { %510 = vperm.xlu1 %1222, %v1501_v0  }
  0x72   : > { %514 = vperm.xlu1 %1222, %v1532_v6  }
  0x76   : > { %522 = vperm.xlu1 %1222, %v1550_v9  }
  0x7a   : > { %530 = vperm.xlu1 %1222, %v1565_v11  }
  0x7e   : > { %538 = vperm.xlu1 %1222, %v1560_v10  }
  0x82   : > { %546 = vperm.xlu1 %1222, %v1598_v15  }
  0x86   : > { %554 = vperm.xlu1 %1222, %v1575_v12  }
  0x8a   : > { %562 = vperm.xlu1 %1222, %v1615_v17  }
  0x8e   : > { %v311_v19 = vpop.permute.xlu1 %310  ;;  %v319_v20 = vpop.permute.xlu0 %318 }
  0x92   : > { %v315_v21 = vpop.permute.xlu1 %314  ;;  %v335_v22 = vpop.permute.xlu0 %334 }
  0x96   : > { %v1628_v23 = vpop.permute.xlu0 %350 }
  0x97   : > { %v225_v24 = vpop.permute.xlu1 %224 }
  0x98   : > { %v296_v26 = vmul.f32 %v1630_v25, %v225_v24 }
  0x9b   : > { %v210_v27 = vpop.permute.xlu0 %209 }
  0x9c   : > { %v293_v28 = vmul.f32 %v1630_v25, %v210_v27  ;;  %v323_v29 = vpop.permute.xlu1 %322 }
  0x9d   : > { %v1634_v30 = vadd.f32 %v323_v29, %v296_v26 }
  0x9e   : > { %v1636_v31 = vadd.f32 %v311_v19, %v293_v28 }
  0x9f   : > { %v392_v32 = vsub.f32 0.0, %v1634_v30  ;;  %v215_v33 = vpop.permute.xlu0 %214 }
  0xa0   : > { %v389_v34 = vsub.f32 0.0, %v1636_v31  ;;  %v294_v35 = vmul.f32 %v1630_v25, %v215_v33 }
  0xa1   : > { %v230_v36 = vpop.permute.xlu1 %229  ;;  %v411_v38 = vmul.f32 1.442695, %v392_v32 }
  0xa2   : > { %v405_v37 = vmul.f32 1.442695, %v389_v34  ;;  %v1641_v39 = vadd.f32 %v315_v21, %v294_v35  ;;  %v297_v43 = vmul.f32 %v1630_v25, %v230_v36 }
  0xa3   : > { %v220_v40 = vpop.permute.xlu0 %219 }
  0xa4   : > { %1225 = vpow2.f32 %v405_v37  ;;  %v390_v41 = vsub.f32 0.0, %v1641_v39  ;;  %v295_v42 = vmul.f32 %v1630_v25, %v220_v40 }
  0xa5   : > { %1227 = vpow2.f32 %v411_v38 }
  0xa6   : > { %v407_v44 = vmul.f32 1.442695, %v390_v41  ;;  %v1646_v45 = vadd.f32 %v319_v20, %v295_v42  ;;  %v327_v46 = vpop.permute.xlu1 %326 }
  0xa7   : > { %v1648_v47 = vadd.f32 %v327_v46, %v297_v43  ;;  %v235_v48 = vpop.permute.xlu0 %234 }
  0xa8   : > { %1229 = vpow2.f32 %v407_v44  ;;  %v391_v49 = vsub.f32 0.0, %v1646_v45  ;;  %v298_v50 = vmul.f32 %v1630_v25, %v235_v48 }
  0xa9   : > { %v393_v52 = vsub.f32 0.0, %v1648_v47 }
  0xaa   : > { %v409_v53 = vmul.f32 1.442695, %v391_v49  ;;  %v331_v54 = vpop.permute.xlu1 %330 }
  0xab   : > { %v413_v55 = vmul.f32 1.442695, %v393_v52  ;;  %v1655_v56 = vadd.f32 %v331_v54, %v298_v50  ;;  %v240_v57 = vpop.permute.xlu0 %239 }
  0xac   : > { %1231 = vpow2.f32 %v409_v53  ;;  %v299_v58 = vmul.f32 %v1630_v25, %v240_v57 }
  0xad   : > { %1233 = vpow2.f32 %v413_v55  ;;  %v394_v59 = vsub.f32 0.0, %v1655_v56 }
  0xae   : > { %v1226_v60 = vpop.eup %1225  ;;  %v1661_v61 = vadd.f32 %v335_v22, %v299_v58 }
  0xaf   : > { %v437_v62 = vadd.f32 1.0, %v1226_v60  ;;  %v415_v63 = vmul.f32 1.442695, %v394_v59  ;;  %v245_v2 = vpop.permute.xlu1 %244  ;;  %v1228_v4 = vpop.eup %1227 }
  0xb0   : > { %v395_v7 = vsub.f32 0.0, %v1661_v61  ;;  %v440_v0 = vadd.f32 1.0, %v1228_v4  ;;  %v300_v8 = vmul.f32 %v1630_v25, %v245_v2  ;;  %v255_v21 = vpop.permute.xlu0 %254 }
  0xb1   : > { %1235 = vpow2.f32 %v415_v63  ;;  %v302_v5 = vmul.f32 %v1630_v25, %v255_v21 }
  0xb2   : > { %v1230_v18 = vpop.eup %1229  ;;  %v417_v19 = vmul.f32 1.442695, %v395_v7  ;;  %1237 = vrcp.f32 %v437_v62 }
  0xb3   : > { %v438_v20 = vadd.f32 1.0, %v1230_v18 }
  0xb4   : > { %1239 = vpow2.f32 %v417_v19  ;;  %v339_v22 = vpop.permute.xlu1 %338  ;;  %v260_v33 = vpop.permute.xlu0 %259 }
  0xb5   : > { %1241 = vrcp.f32 %v438_v20  ;;  %v1667_v24 = vadd.f32 %v339_v22, %v300_v8  ;;  %v303_v35 = vmul.f32 %v1630_v25, %v260_v33 }
  0xb6   : > { %v1232_v6 = vpop.eup %1231  ;;  %1243 = vrcp.f32 %v440_v0 }
  0xb7   : > { %v1234_v3 = vpop.eup %1233  ;;  %v439_v26 = vadd.f32 1.0, %v1232_v6  ;;  %v396_v27 = vsub.f32 0.0, %v1667_v24  ;;  %v1684_v44 = vadd.f32 %v1628_v23, %v303_v35 }
  0xb8   : > { %v441_v28 = vadd.f32 1.0, %v1234_v3  ;;  %v275_v60 = vpop.permute.xlu0 %274 }
  0xb9   : > { %1245 = vrcp.f32 %v439_v26  ;;  %v419_v29 = vmul.f32 1.442695, %v396_v27  ;;  %v250_v32 = vpop.permute.xlu1 %249  ;;  %v399_v52 = vsub.f32 0.0, %v1684_v44 }
  0xba   : > { %v301_v36 = vmul.f32 %v1630_v25, %v250_v32 }
  0xbb   : > { %1247 = vpow2.f32 %v419_v29  ;;  %v1236_v34 = vpop.eup %1235 }
  0xbc   : > { %v1238_v9 = vpop.eup %1237  ;;  %1249 = vrcp.f32 %v441_v28  ;;  %v442_v13 = vadd.f32 1.0, %v1236_v34  ;;  %v280_v17 = vpop.permute.xlu0 %279 }
  0xbd   : > { %v469_v41 = vmul.f32 %v1238_v9, %v1636_v31  ;;  %v307_v22 = vmul.f32 %v1630_v25, %v280_v17  ;;  %v486_v17 = vld [vmem:[%s1883_s2 + $0x8] sm:$0xff] }
  0xbe   : > { %v1240_v37 = vpop.eup %1239  ;;  %v343_v38 = vpop.permute.xlu1 %342  ;;  %1251 = vrcp.f32 %v442_v13 }
  0xbf   : > { %v1242_v40 = vpop.eup %1241  ;;  %v1679_v11 = vadd.f32 %v343_v38, %v301_v36  ;;  %v443_v16 = vadd.f32 1.0, %v1240_v37 }
  0xc0   : > { %v470_v42 = vmul.f32 %v1242_v40, %v1641_v39  ;;  %v1244_v43 = vpop.eup %1243  ;;  %v367_v27 = vpop.permute.xlu0 %366 }
  0xc1   : > { %v397_v10 = vsub.f32 0.0, %v1679_v11  ;;  %v472_v31 = vmul.f32 %v1244_v43, %v1634_v30  ;;  %v387_v33 = vadd.f32 %v367_v27, %v307_v22  ;;  %v494_v22 = vld [vmem:[%s1883_s2 + $0x48] sm:$0xff] }
  0xc2   : > { %v347_v46 = vpop.permute.xlu1 %346  ;;  %v1102_v48 = vpack.c.bf16 %v470_v42, %v469_v41  ;;  %v498_v27 = vld [vmem:[%s1883_s2 + $0x68] sm:$0xff] }
  0xc3   : > { %v1246_v49 = vpop.eup %1245  ;;  %v421_v50 = vmul.f32 1.442695, %v397_v10  ;;  %v1689_v51 = vadd.f32 %v347_v46, %v302_v5  ;;  %v403_v37 = vsub.f32 0.0, %v387_v33 }
  0xc4   : > { %v471_v39 = vmul.f32 %v1246_v49, %v1646_v45  ;;  %1103 = vmatprep.subr.bf16.mxu0 %v1102_v48  ;;  %v425_v45 = vmul.f32 1.442695, %v399_v52 }
  0xc5   : > { %v1248_v23 = vpop.eup %1247  ;;  %1253 = vpow2.f32 %v421_v50  ;;  %v398_v15 = vsub.f32 0.0, %v1689_v51  ;;  %1105 = vmatpush3.bf16.msra.mxu0 %v1102_v48  ;;  %v433_v10 = vmul.f32 1.442695, %v403_v37 }
  0xc6   : > { %1255 = vrcp.f32 %v443_v16  ;;  %v444_v14 = vadd.f32 1.0, %v1248_v23  ;;  %v1106_v53 = vpack.c.bf16 %v472_v31, %v471_v39  ;;  %v1250_v54 = vpop.eup %1249 }
  0xc7   : > { %v423_v55 = vmul.f32 1.442695, %v398_v15  ;;  %v265_v57 = vpop.permute.xlu1 %264  ;;  %v473_v58 = vmul.f32 %v1250_v54, %v1648_v47 }
  0xc8   : > { %1257 = vrcp.f32 %v444_v14  ;;  %1107 = vmatprep.subr.bf16.mxu0 %v1106_v53  ;;  %v1252_v30 = vpop.eup %1251  ;;  %v304_v12 = vmul.f32 %v1630_v25, %v265_v57 }
  0xc9   : > { %1109 = vmatpush3.bf16.msra.mxu0 %v1106_v53  ;;  %v474_v59 = vmul.f32 %v1252_v30, %v1655_v56  ;;  %1259 = vpow2.f32 %v423_v55 }
  0xca   : > { %1261 = vpow2.f32 %v425_v45 }
  0xcb   : > { %v1110_v63 = vpack.c.bf16 %v474_v59, %v473_v58 }
  0xcc   : > { %v355_v62 = vpop.permute.xlu1 %354 }
  0xcd   : > { %v1700_v2 = vadd.f32 %v355_v62, %v304_v12  ;;  %1111 = vmatprep.subr.bf16.mxu0 %v1110_v63 }
  0xce   : > { %1113 = vmatpush3.bf16.msra.mxu0 %v1110_v63 }
  0xcf   : > { %v1254_v4 = vpop.eup %1253  ;;  %v400_v7 = vsub.f32 0.0, %v1700_v2 }
  0xd0   : > { %v1256_v18 = vpop.eup %1255  ;;  %v445_v19 = vadd.f32 1.0, %v1254_v4 }
  0xd1   : > { %v427_v47 = vmul.f32 1.442695, %v400_v7  ;;  %v270_v0 = vpop.permute.xlu1 %269  ;;  %v475_v20 = vmul.f32 %v1256_v18, %v1661_v61  ;;  %v306_v61 = vmul.f32 %v1630_v25, %v275_v60 }
  0xd2   : > { %v1258_v56 = vpop.eup %1257  ;;  %v305_v3 = vmul.f32 %v1630_v25, %v270_v0  ;;  %v489_v0 = vld [vmem:[%s1883_s2 + $0x20] sm:$0xff] }
  0xd3   : > { %v476_v8 = vmul.f32 %v1258_v56, %v1667_v24  ;;  %1263 = vpow2.f32 %v427_v47  ;;  %v1260_v21 = vpop.eup %1259  ;;  %v488_v47 = vld [vmem:[%s1883_s2 + $0x18] sm:$0xff]  ;;  %v490_v56 = vld [vmem:[%s1883_s2 + $0x28] sm:$0xff] }
  0xd4   : > { %1265 = vrcp.f32 %v445_v19  ;;  %v446_v6 = vadd.f32 1.0, %v1260_v21  ;;  %v1262_v29 = vpop.eup %1261  ;;  %v487_v19 = vld [vmem:[%s1883_s2 + $0x10] sm:$0xff]  ;;  %v493_v21 = vld [vmem:[%s1883_s2 + $0x40] sm:$0xff] }
  0xd5   : > { %v1114_v26 = vpack.c.bf16 %v476_v8, %v475_v20  ;;  %v447_v34 = vadd.f32 1.0, %v1262_v29  ;;  %v491_v20 = vld [vmem:[%s1883_s2 + $0x30] sm:$0xff]  ;;  %v492_v8 = vld [vmem:[%s1883_s2 + $0x38] sm:$0xff] }
  0xd6   : > { %v359_v28 = vpop.permute.xlu1 %358  ;;  %1267 = vrcp.f32 %v446_v6  ;;  %v495_v6 = vld [vmem:[%s1883_s2 + $0x50] sm:$0xff]  ;;  %v500_v29 = vld [vmem:[%s1883_s2 + $0x78] sm:$0xff] }
  0xd7   : > { %v385_v32 = vadd.f32 %v359_v28, %v305_v3  ;;  %1115 = vmatprep.subr.bf16.mxu0 %v1114_v26  ;;  %v496_v3 = vld [vmem:[%s1883_s2 + $0x58] sm:$0xff]  ;;  %v499_v28 = vld [vmem:[%s1883_s2 + $0x70] sm:$0xff] }
  0xd8   : > { %1117 = vmatpush3.bf16.msra.mxu0 %v1114_v26  ;;  %v497_v26 = vld [vmem:[%s1883_s2 + $0x60] sm:$0xff] }
  0xd9   : > { %v401_v24 = vsub.f32 0.0, %v385_v32 }
  0xda   : > { %v363_v9 = vpop.permute.xlu1 %362 }
  0xdb   : > { %v429_v13 = vmul.f32 1.442695, %v401_v24  ;;  %v386_v35 = vadd.f32 %v363_v9, %v306_v61  ;;  %v1422_v61 = vmov 0.0  }
  0xdc   : > { %1099 = vmatprep.mubr.msk.f32.mxu1 %vm1421_vm0, %v1422_v61 }
  0xdd   : > { %v1264_v36 = vpop.eup %1263  ;;  %1269 = vpow2.f32 %v429_v13  ;;  %v402_v38 = vsub.f32 0.0, %v386_v35  ;;  %v507_v13 = vpop.permute.xlu0 %506 }
  0xde   : > { %1271 = vrcp.f32 %v447_v34  ;;  %v448_v40 = vadd.f32 1.0, %v1264_v36  ;;  %v1266_v5 = vpop.eup %1265 }
  0xdf   : > { %v431_v41 = vmul.f32 1.442695, %v402_v38  ;;  %v285_v42 = vpop.permute.xlu1 %284  ;;  %v477_v16 = vmul.f32 %v1266_v5, %v1679_v11 }
  0xe0   : > { %1273 = vrcp.f32 %v448_v40  ;;  %v1268_v43 = vpop.eup %1267  ;;  %v308_v48 = vmul.f32 %v1630_v25, %v285_v42 }
  0xe1   : > { %1275 = vpow2.f32 %v431_v41  ;;  %v478_v46 = vmul.f32 %v1268_v43, %v1689_v51  ;;  %v519_v36 = vpop.permute.xlu0 %518 }
  0xe2   : > { %1277 = vpow2.f32 %v433_v10 }
  0xe3   : > { %v1118_v50 = vpack.c.bf16 %v478_v46, %v477_v16 }
  0xe4   : > { %v371_v49 = vpop.permute.xlu1 %370 }
  0xe5   : > { %v388_v31 = vadd.f32 %v371_v49, %v308_v48  ;;  %1119 = vmatprep.subr.bf16.mxu0 %v1118_v50  ;;  %v527_v16 = vpop.permute.xlu0 %526 }
  0xe6   : > { %1121 = vmatpush3.bf16.msra.mxu0 %v1118_v50 }
  0xe7   : > { %v1270_v39 = vpop.eup %1269  ;;  %v404_v23 = vsub.f32 0.0, %v388_v31 }
  0xe8   : > { %v1272_v52 = vpop.eup %1271  ;;  %v449_v15 = vadd.f32 1.0, %v1270_v39 }
  0xe9   : > { %v435_v14 = vmul.f32 1.442695, %v404_v23  ;;  %v479_v55 = vmul.f32 %v1272_v52, %v1684_v44  ;;  %v503_v24 = vpop.permute.xlu1 %502 }
  0xea   : > { %v1274_v53 = vpop.eup %1273 }
  0xeb   : > { %v1276_v54 = vpop.eup %1275  ;;  %v480_v11 = vmul.f32 %v1274_v53, %v1700_v2  ;;  %1279 = vpow2.f32 %v435_v14 }
  0xec   : > { %1281 = vrcp.f32 %v449_v15  ;;  %v450_v25 = vadd.f32 1.0, %v1276_v54  ;;  %v1278_v57 = vpop.eup %1277 }
  0xed   : > { %v1122_v51 = vpack.c.bf16 %v480_v11, %v479_v55  ;;  %v451_v30 = vadd.f32 1.0, %v1278_v57  ;;  %v511_v34 = vpop.permute.xlu1 %510  ;;  %v535_v11 = vpop.permute.xlu0 %534 }
  0xee   : > { %1283 = vrcp.f32 %v450_v25 }
  0xef   : > { %1123 = vmatprep.subr.bf16.mxu0 %v1122_v51  ;;  %1285 = vrcp.f32 %v451_v30 }
  0xf0   : > { %1125 = vmatpush3.bf16.msra.mxu0 %v1122_v51 }
  0xf1   : > { %v515_v9 = vpop.permute.xlu1 %514 }
  0xf5   : > { %v1280_v45 = vpop.eup %1279 }
  0xf6   : > { %v1282_v58 = vpop.eup %1281  ;;  %v452_v59 = vadd.f32 1.0, %v1280_v45 }
  0xf7   : > { %v481_v12 = vmul.f32 %v1282_v58, %v385_v32  ;;  %v1420_v32 = vmov 0.0|0.0  }
  0xf8   : > { %v1284_v60 = vpop.eup %1283  ;;  %1287 = vrcp.f32 %v452_v59  ;;  %1134 = vmatprep.subr.bf16.mxu1 %v1420_v32 }
  0xf9   : > { %v482_v62 = vmul.f32 %v1284_v60, %v386_v35  ;;  %v1286_v63 = vpop.eup %1285  ;;  %v523_v35 = vpop.permute.xlu1 %522 }
  0xfa   : > { %v483_v4 = vmul.f32 %v1286_v63, %v387_v33  ;;  %v1423_v33 = vmov 3  }
  0xfb   : > { %v1126_v44 = vpack.c.bf16 %v482_v62, %v481_v12  ;;  %1224 = vset.pattern.permute.xlu0 %v1423_v33 }
  0xfc   : > { %808 = vperm.xlu0 %1224, %v1506_v1  }
  0xfd   : > { %1127 = vmatprep.subr.bf16.mxu0 %v1126_v44  ;;  %v531_v42 = vpop.permute.xlu1 %530 }
  0xfe   : > { %1129 = vmatpush3.bf16.msra.mxu0 %v1126_v44 }
 0x101   : > { %v539_v53 = vpop.permute.xlu1 %538 }
 0x102   : > { %v1288_v2 = vpop.eup %1287 }
 0x103   : > { %v484_v7 = vmul.f32 %v1288_v2, %v388_v31 }
 0x105   : > { %v1130_v18 = vpack.c.bf16 %v484_v7, %v483_v4  ;;  %v547_v62 = vpop.permute.xlu1 %546  ;;  %v543_v4 = vpop.permute.xlu0 %542 }
 0x107   : > { %1131 = vmatprep.subr.bf16.mxu0 %v1130_v18 }
 0x108   : > { %1133 = vmatpush3.bf16.msra.mxu0 %v1130_v18 }
 0x10b   : > { %1044 = vmatmul.mubr.f32.vlgmr.msra.gmra.mrb[0].mxu0 %v486_v17 }
 0x10c   : > { %1046 = vmatprep.mubr.f32.mxu0 %v487_v19 }
 0x10f   : > { %1047 = vmatmul.mubr.f32.gmra.mrb[2].mxu0 %v488_v47 }
 0x110   : > { %1049 = vmatprep.mubr.f32.mxu0 %v489_v0 }
 0x113   : > { %1050 = vmatmul.mubr.f32.gmra.mrb[4].mxu0 %v490_v56 }
 0x114   : > { %1052 = vmatprep.mubr.f32.mxu0 %v491_v20 }
 0x117   : > { %1053 = vmatmul.mubr.f32.gmra.mrb[6].mxu0 %v492_v8 }
 0x118   : > { %1055 = vmatprep.mubr.f32.mxu0 %v493_v21 }
 0x11b   : > { %1056 = vmatmul.mubr.f32.gmra.mrb[8].mxu0 %v494_v22 }
 0x11c   : > { %1058 = vmatprep.mubr.f32.mxu0 %v495_v6 }
 0x11f   : > { %1059 = vmatmul.mubr.f32.gmra.mrb[10].mxu0 %v496_v3 }
 0x120   : > { %1061 = vmatprep.mubr.f32.mxu0 %v497_v26 }
 0x123   : > { %1062 = vmatmul.mubr.f32.gmra.mrb[12].mxu0 %v498_v27 }
 0x124   : > { %1064 = vmatprep.mubr.f32.mxu0 %v499_v28 }
 0x127   : > { %1065 = vmatmul.mubr.f32.gmra.mrb[14].mxu0 %v500_v29  ;;  %v555_v29 = vpop.permute.xlu1 %554 }
 0x1de   : > { %v1045_v37 = vpop.f32.mrb[0].mxu0 }
 0x1df   : > { %v1760_v38 = vadd.f32 %v1045_v37, %v507_v13  ;;  %v631_v40 = vpop.f32.mrb[1].mxu0 }
 0x1e0   : > { %v1762_v5 = vadd.f32 %v631_v40, %v503_v24 }
 0x1e1   : > { %v711_v41 = vsub.f32 0.0, %v1760_v38 }
 0x1e2   : > { %v710_v43 = vsub.f32 0.0, %v1762_v5  ;;  %v1048_v10 = vpop.f32.mrb[2].mxu0 }
 0x1e3   : > { %v728_v1 = vmul.f32 1.442695, %v711_v41  ;;  %v1766_v46 = vadd.f32 %v1048_v10, %v515_v9  ;;  %v641_v48 = vpop.f32.mrb[3].mxu0 }
 0x1e4   : > { %v726_v49 = vmul.f32 1.442695, %v710_v43  ;;  %v1768_v50 = vadd.f32 %v641_v48, %v511_v34  ;;  %v551_v34 = vpop.permute.xlu0 %550 }
 0x1e5   : > { %1289 = vpow2.f32 %v728_v1  ;;  %v713_v31 = vsub.f32 0.0, %v1766_v46 }
 0x1e6   : > { %1291 = vpow2.f32 %v726_v49  ;;  %v712_v39 = vsub.f32 0.0, %v1768_v50  ;;  %v1051_v23 = vpop.f32.mrb[4].mxu0 }
 0x1e7   : > { %v732_v52 = vmul.f32 1.442695, %v713_v31  ;;  %v1772_v15 = vadd.f32 %v1051_v23, %v523_v35  ;;  %v651_v14 = vpop.f32.mrb[5].mxu0  ;;  %v563_v31 = vpop.permute.xlu1 %562 }
 0x1e8   : > { %v730_v54 = vmul.f32 1.442695, %v712_v39  ;;  %v1774_v55 = vadd.f32 %v651_v14, %v519_v36  ;;  %v559_v14 = vpop.permute.xlu0 %558 }
 0x1e9   : > { %1293 = vpow2.f32 %v732_v52  ;;  %v715_v25 = vsub.f32 0.0, %v1772_v15 }
 0x1ea   : > { %1295 = vpow2.f32 %v730_v54  ;;  %v714_v51 = vsub.f32 0.0, %v1774_v55  ;;  %v1054_v57 = vpop.f32.mrb[6].mxu0 }
 0x1eb   : > { %v736_v30 = vmul.f32 1.442695, %v715_v25  ;;  %v1778_v45 = vadd.f32 %v1054_v57, %v531_v42  ;;  %v661_v58 = vpop.f32.mrb[7].mxu0 }
 0x1ec   : > { %v734_v59 = vmul.f32 1.442695, %v714_v51  ;;  %v1780_v60 = vadd.f32 %v661_v58, %v527_v16 }
 0x1ed   : > { %1297 = vpow2.f32 %v736_v30  ;;  %v717_v12 = vsub.f32 0.0, %v1778_v45 }
 0x1ee   : > { %1299 = vpow2.f32 %v734_v59  ;;  %v716_v44 = vsub.f32 0.0, %v1780_v60  ;;  %v1057_v63 = vpop.f32.mrb[8].mxu0 }
 0x1ef   : > { %v1290_v2 = vpop.eup %1289  ;;  %v740_v7 = vmul.f32 1.442695, %v717_v12  ;;  %v1784_v18 = vadd.f32 %v1057_v63, %v539_v53  ;;  %v671_v17 = vpop.f32.mrb[9].mxu0 }
 0x1f0   : > { %v1292_v19 = vpop.eup %1291  ;;  %v759_v47 = vadd.f32 1.0, %v1290_v2  ;;  %v738_v0 = vmul.f32 1.442695, %v716_v44  ;;  %v1786_v56 = vadd.f32 %v671_v17, %v535_v11 }
 0x1f1   : > { %v758_v20 = vadd.f32 1.0, %v1292_v19  ;;  %1301 = vpow2.f32 %v740_v7  ;;  %v719_v8 = vsub.f32 0.0, %v1784_v18 }
 0x1f2   : > { %1303 = vrcp.f32 %v759_v47  ;;  %v718_v21 = vsub.f32 0.0, %v1786_v56  ;;  %v1060_v22 = vpop.f32.mrb[10].mxu0 }
 0x1f3   : > { %v1294_v6 = vpop.eup %1293  ;;  %1305 = vrcp.f32 %v758_v20  ;;  %v744_v3 = vmul.f32 1.442695, %v719_v8  ;;  %v1790_v26 = vadd.f32 %v1060_v22, %v547_v62  ;;  %v681_v27 = vpop.f32.mrb[11].mxu0 }
 0x1f4   : > { %v1296_v28 = vpop.eup %1295  ;;  %v761_v61 = vadd.f32 1.0, %v1294_v6  ;;  %1307 = vpow2.f32 %v738_v0  ;;  %v742_v33 = vmul.f32 1.442695, %v718_v21  ;;  %v1792_v24 = vadd.f32 %v681_v27, %v543_v4 }
 0x1f5   : > { %v760_v9 = vadd.f32 1.0, %v1296_v28  ;;  %1309 = vpow2.f32 %v744_v3  ;;  %v721_v13 = vsub.f32 0.0, %v1790_v26 }
 0x1f6   : > { %1311 = vrcp.f32 %v761_v61  ;;  %v720_v35 = vsub.f32 0.0, %v1792_v24  ;;  %v1063_v36 = vpop.f32.mrb[12].mxu0 }
 0x1f7   : > { %v1298_v37 = vpop.eup %1297  ;;  %1313 = vrcp.f32 %v760_v9  ;;  %v748_v40 = vmul.f32 1.442695, %v721_v13  ;;  %v1796_v41 = vadd.f32 %v1063_v36, %v555_v29  ;;  %v691_v42 = vpop.f32.mrb[13].mxu0 }
 0x1f8   : > { %v1300_v43 = vpop.eup %1299  ;;  %v763_v10 = vadd.f32 1.0, %v1298_v37  ;;  %1315 = vpow2.f32 %v742_v33  ;;  %v746_v16 = vmul.f32 1.442695, %v720_v35  ;;  %v1798_v1 = vadd.f32 %v691_v42, %v551_v34 }
 0x1f9   : > { %v762_v48 = vadd.f32 1.0, %v1300_v43  ;;  %1317 = vpow2.f32 %v748_v40  ;;  %v723_v49 = vsub.f32 0.0, %v1796_v41 }
 0x1fa   : > { %1319 = vrcp.f32 %v763_v10  ;;  %v722_v39 = vsub.f32 0.0, %v1798_v1  ;;  %v1066_v23 = vpop.f32.mrb[14].mxu0 }
 0x1fb   : > { %v1302_v52 = vpop.eup %1301  ;;  %1321 = vrcp.f32 %v762_v48  ;;  %v752_v53 = vmul.f32 1.442695, %v723_v49  ;;  %v1802_v54 = vadd.f32 %v1066_v23, %v563_v31  ;;  %v701_v11 = vpop.f32.mrb[15].mxu0 }
 0x1fc   : > { %v1304_v25 = vpop.eup %1303  ;;  %v765_v51 = vadd.f32 1.0, %v1302_v52  ;;  %1323 = vpow2.f32 %v746_v16  ;;  %v750_v57 = vmul.f32 1.442695, %v722_v39  ;;  %v1804_v30 = vadd.f32 %v701_v11, %v559_v14 }
 0x1fd   : > { %v1306_v58 = vpop.eup %1305  ;;  %v791_v59 = vmul.f32 %v1304_v25, %v1760_v38  ;;  %1325 = vpow2.f32 %v752_v53  ;;  %v725_v12 = vsub.f32 0.0, %v1802_v54 }
 0x1fe   : > { %v1308_v62 = vpop.eup %1307  ;;  %v790_v44 = vmul.f32 %v1306_v58, %v1762_v5  ;;  %1327 = vrcp.f32 %v765_v51  ;;  %v724_v63 = vsub.f32 0.0, %v1804_v30 }
 0x1ff   : > { %v1310_v2 = vpop.eup %1309  ;;  %v764_v4 = vadd.f32 1.0, %v1308_v62  ;;  %1329 = vpow2.f32 %v750_v57  ;;  %v756_v7 = vmul.f32 1.442695, %v725_v12 }
 0x200   : > { %v1312_v17 = vpop.eup %1311  ;;  %v767_v19 = vadd.f32 1.0, %v1310_v2  ;;  %v754_v47 = vmul.f32 1.442695, %v724_v63  ;;  %v1135_v0 = vpack.c.bf16 %v791_v59, %v790_v44  ;;  %v809_v59 = vpop.permute.xlu0 %808 }
 0x201   : > { %v1314_v20 = vpop.eup %1313  ;;  %v793_v38 = vmul.f32 %v1312_v17, %v1766_v46  ;;  %1331 = vrcp.f32 %v764_v4 }
 0x202   : > { %v1316_v8 = vpop.eup %1315  ;;  %v792_v21 = vmul.f32 %v1314_v20, %v1768_v50  ;;  %1333 = vrcp.f32 %v767_v19  ;;  %1136 = vmatpush3.bf16.msra.mxu1 %v1135_v0 }
 0x203   : > { %v1318_v5 = vpop.eup %1317  ;;  %v766_v22 = vadd.f32 1.0, %v1316_v8  ;;  %1335 = vpow2.f32 %v756_v7  ;;  %1137 = vmatprep.subr.bf16.mxu1 %v1420_v32 }
 0x204   : > { %v1320_v6 = vpop.eup %1319  ;;  %v769_v3 = vadd.f32 1.0, %v1318_v5  ;;  %1337 = vpow2.f32 %v754_v47  ;;  %v1138_v27 = vpack.c.bf16 %v793_v38, %v792_v21 }
 0x205   : > { %v1322_v28 = vpop.eup %1321  ;;  %v795_v29 = vmul.f32 %v1320_v6, %v1772_v15  ;;  %1339 = vrcp.f32 %v766_v22 }
 0x206   : > { %v1324_v46 = vpop.eup %1323  ;;  %v794_v61 = vmul.f32 %v1322_v28, %v1774_v55  ;;  %1341 = vrcp.f32 %v769_v3  ;;  %1139 = vmatpush3.bf16.msra.mxu1 %v1138_v27 }
 0x207   : > { %v1326_v50 = vpop.eup %1325  ;;  %v768_v33 = vadd.f32 1.0, %v1324_v46  ;;  %1140 = vmatprep.subr.bf16.mxu1 %v1420_v32 }
 0x208   : > { %v1328_v34 = vpop.eup %1327  ;;  %v771_v9 = vadd.f32 1.0, %v1326_v50  ;;  %v1141_v13 = vpack.c.bf16 %v795_v29, %v794_v61 }
 0x209   : > { %v1330_v35 = vpop.eup %1329  ;;  %1343 = vrcp.f32 %v768_v33  ;;  %v797_v36 = vmul.f32 %v1328_v34, %v1778_v45 }
 0x20a   : > { %1345 = vrcp.f32 %v771_v9  ;;  %v770_v37 = vadd.f32 1.0, %v1330_v35  ;;  %1142 = vmatpush3.bf16.msra.mxu1 %v1141_v13 }
 0x20b   : > { %v1332_v15 = vpop.eup %1331  ;;  %1143 = vmatprep.subr.bf16.mxu1 %v1420_v32 }
 0x20c   : > { %v1334_v55 = vpop.eup %1333  ;;  %v796_v40 = vmul.f32 %v1332_v15, %v1780_v60  ;;  %1347 = vrcp.f32 %v770_v37 }
 0x20d   : > { %v1336_v42 = vpop.eup %1335  ;;  %v799_v10 = vmul.f32 %v1334_v55, %v1784_v18 }
 0x20e   : > { %v1338_v43 = vpop.eup %1337  ;;  %v773_v16 = vadd.f32 1.0, %v1336_v42  ;;  %v1144_v48 = vpack.c.bf16 %v797_v36, %v796_v40 }
 0x20f   : > { %v1340_v49 = vpop.eup %1339  ;;  %v772_v31 = vadd.f32 1.0, %v1338_v43 }
 0x210   : > { %v1342_v39 = vpop.eup %1341  ;;  %v798_v45 = vmul.f32 %v1340_v49, %v1786_v56  ;;  %1349 = vrcp.f32 %v773_v16  ;;  %1145 = vmatpush3.bf16.msra.mxu1 %v1144_v48 }
 0x211   : > { %1351 = vrcp.f32 %v772_v31  ;;  %1146 = vmatprep.subr.bf16.mxu1 %v1420_v32  ;;  %v801_v23 = vmul.f32 %v1342_v39, %v1790_v26 }
 0x212   : > { %v1147_v60 = vpack.c.bf16 %v799_v10, %v798_v45 }
 0x213   : > { %v1344_v52 = vpop.eup %1343 }
 0x214   : > { %v1346_v14 = vpop.eup %1345  ;;  %v800_v53 = vmul.f32 %v1344_v52, %v1792_v24  ;;  %1148 = vmatpush3.bf16.msra.mxu1 %v1147_v60 }
 0x215   : > { %v803_v18 = vmul.f32 %v1346_v14, %v1796_v41  ;;  %1149 = vmatprep.subr.bf16.mxu1 %v1420_v32 }
 0x216   : > { %v1348_v11 = vpop.eup %1347  ;;  %v1150_v56 = vpack.c.bf16 %v801_v23, %v800_v53 }
 0x217   : > { %v802_v25 = vmul.f32 %v1348_v11, %v1798_v1  ;;  %v806_v1 = vld [vmem:[%s1884_s3] sm:$0xff] }
 0x218   : > { %1151 = vmatpush3.bf16.msra.mxu1 %v1150_v56 }
 0x219   : > { %1152 = vmatprep.subr.bf16.mxu1 %v1420_v32  ;;  %v1153_v26 = vpack.c.bf16 %v803_v18, %v802_v25 }
 0x21a   : > { %v1350_v51 = vpop.eup %1349 }
 0x21b   : > { %v1352_v57 = vpop.eup %1351  ;;  %v805_v58 = vmul.f32 %v1350_v51, %v1802_v54 }
 0x21c   : > { %v804_v24 = vmul.f32 %v1352_v57, %v1804_v30  ;;  %1154 = vmatpush3.bf16.msra.mxu1 %v1153_v26 }
 0x21d   : > { %1155 = vmatprep.subr.bf16.mxu1 %v1420_v32 }
 0x21e   : > { %v1156_v41 = vpack.c.bf16 %v805_v58, %v804_v24 }
 0x220   : > { %1157 = vmatpush3.bf16.msra.mxu1 %v1156_v41 }
 0x223   : > { %1100 = vmatmul.mubr.f32.vlgmr.msra.gmra.mrb[0].mxu1 %v806_v1 }
 0x2f6   : > { %v877_v54 = vpop.f32.mrb[0].mxu1 }
 0x2f7   : > { %v878_v12 = vadd.f32 %v877_v54, %v809_v59  ;;  %v1101_v30 = vpop.f32.mrb[1].mxu1 }
 0x2f9   : > { %881 = vst [vmem:[%s186_s6] sm:$0xff] %v878_v12 }
 0x2fa   : > { %1366 = shalt.err (!%p1363_p3)
}
 0x2fb   : > { %s1367_s20 = scalar_lea.hbm %s1839_s10, 128  ;;  %s1371_s27 = scalar_lea.hbm %s1885_s4, 256 }
 0x2fc   : > { %p1368_p4 = scmp.ne.s32.totalorder %s1839_s10, %s1367_s20  ;;  %p1372_p9 = scmp.lt.u32.totalorder %s1839_s10, %s1885_s4 }
 0x2fd   : > { %p1373_p10 = scmp.lt.u32.totalorder %s1371_s27, %s1367_s20  ;;  %p1375_p12 = scmp.lt.u32.totalorder %s1367_s20, %s1839_s10 }
 0x2fe   : > { %p1369_p7 = pnand %p1368_p4, %p1488_p5 }
 0x2ff   : > { %p1374_p11 = por %p1373_p10, %p1372_p9 }
 0x300   : > { %p1370_p8 = pneg %p1369_p7 }
 0x301   : > { %p1376_p13 = por %p1375_p12, %p1374_p11 }
 0x303   : > { %p1377_p0 = pnand %p1376_p13, %p1370_p8 }
 0x305   : > { %1380 = shalt.err (!%p1377_p0)
}
 0x306   : > { %1158 = dma.vmem_to_hbm [thread:$0]  (%p1488_p5), %s1841_s7, 128, %s1839_s10, %s883_s11  }
 0x307 PF: > { %p1164_p1 = scmp.ge.s32.totalorder %s1415_s18, 2  ;;  %s908_s30 = sand.u32 1, %s1403_s15  }
 0x308   : > { %s909_s5 = scalar_lea.sflag [#allocation3], %s908_s30 }
 0x309   : > { %p1161_p2 = pnand %p1164_p1, %p1492_p6 }
 0x30b   : > { %1398 = dma.done.wait (!%p1161_p2), %s909_s5, 128  }
 0x30c   : > { %1400 = vsyncadd (!%p1161_p2), %s909_s5, 4294967168  ;;  %p14_p3 = scmp.ge.s32.totalorder %s1475_s21, 4   ;;  %s1888_s15 = smov %s1407_s16 }
 0x30d   : > { %s1889_s16 = smov %s1411_s17  ;;  %s1890_s17 = smov %s1486_s24 }
 0x30e   : > { %s1891_s18 = smov %s1475_s21  ;;  %16 = sbr.rel (!%p14_p3) target bundleno = 3 (0x3), region = 71 }
 0x315   :  { %914 = vsyncpa [#allocation3], 1 }
 0x316   :  { %916 = vsyncpa [#allocation3 + $0x1], 1 }

</bundles_post_ra>
